<compile_context>
chip_gen: v5e
topology: v5e:2x2
jax: 0.10.0
libtpu: 0.0.40
codegen_flags: <defaults>
</compile_context>

<pallas_src>
import functools
import numpy as np

import jax
import jax.numpy as jnp
from jax import lax
from jax.experimental import pallas as pl
from jax.experimental.pallas import tpu as pltpu


# ----------------------------------------------------------------------------
# small helpers
# ----------------------------------------------------------------------------
def _round_up(x, m):
    return (x + m - 1) // m * m


def _pick_tile(dim, unit, cap):
    """Largest t <= cap with dim % t == 0 and t % unit == 0; falls back to dim
    (a full-extent block is always legal)."""
    cap = max(unit, min(int(cap), dim))
    for t in range(cap, unit - 1, -1):
        if dim % t == 0 and t % unit == 0:
            return t
    return dim


# ----------------------------------------------------------------------------
# Pallas tiled matmul (MXU hot path for every conv), bf16 in / f32 accumulate.
# Optional fused addend: bias (1, N) or full residual (M, N).
# ----------------------------------------------------------------------------
def _matmul_kernel(a_ref, b_ref, o_ref, acc_ref):
    k = pl.program_id(2)

    @pl.when(k == 0)
    def _():
        acc_ref[...] = jnp.zeros_like(acc_ref)

    acc_ref[...] += jnp.dot(a_ref[...], b_ref[...],
                            preferred_element_type=jnp.float32)

    @pl.when(k == pl.num_programs(2) - 1)
    def _():
        o_ref[...] = acc_ref[...]


def _matmul_addend_kernel(a_ref, b_ref, c_ref, o_ref, acc_ref):
    k = pl.program_id(2)

    @pl.when(k == 0)
    def _():
        acc_ref[...] = jnp.zeros_like(acc_ref)

    acc_ref[...] += jnp.dot(a_ref[...], b_ref[...],
                            preferred_element_type=jnp.float32)

    @pl.when(k == pl.num_programs(2) - 1)
    def _():
        o_ref[...] = acc_ref[...] + c_ref[...]


@functools.lru_cache(maxsize=None)
def _matmul_call(M, K, N, TM, TK, TN, kind):
    # kind: 0 = plain, 1 = bias addend (1, N), 2 = full addend (M, N)
    ad_rows = 0 if kind == 0 else (1 if kind == 1 else TM)
    need = (2 * (TM * TK * 2 + TK * TN * 2 + TM * TN * 4 + ad_rows * TN * 4)
            + TM * TN * 4 + (2 << 20))
    vmem = int(min(48 << 20, max(need, 8 << 20)))   # <= 48 MiB (v7x-safe)

    in_specs = [pl.BlockSpec((TM, TK), lambda i, j, k: (i, k)),
                pl.BlockSpec((TK, TN), lambda i, j, k: (k, j))]
    if kind == 1:
        in_specs.append(pl.BlockSpec((1, TN), lambda i, j, k: (0, j)))
    elif kind == 2:
        in_specs.append(pl.BlockSpec((TM, TN), lambda i, j, k: (i, j)))
    kernel = _matmul_kernel if kind == 0 else _matmul_addend_kernel

    return pl.pallas_call(
        kernel,
        out_shape=jax.ShapeDtypeStruct((M, N), jnp.float32),
        grid_spec=pltpu.PrefetchScalarGridSpec(
            num_scalar_prefetch=0,
            grid=(M // TM, N // TN, K // TK),
            in_specs=in_specs,
            out_specs=pl.BlockSpec((TM, TN), lambda i, j, k: (i, j)),
            scratch_shapes=[pltpu.VMEM((TM, TN), jnp.float32)]),
        compiler_params=pltpu.CompilerParams(
            dimension_semantics=("parallel", "parallel", "arbitrary"),
            vmem_limit_bytes=vmem))


def pallas_matmul(a, b, addend=None):
    """(M, K) @ (K, N) -> (M, N) f32.  Operands cast to bf16 for the MXU.
    addend: None | (N,) bias | (M, N) residual, fused at the final store."""
    M, K = a.shape
    K2, N = b.shape
    assert K == K2
    a = a.astype(jnp.bfloat16)
    b = b.astype(jnp.bfloat16)

    Mp = _round_up(M, 8)
    if Mp != M:
        a = jnp.pad(a, ((0, Mp - M), (0, 0)))
    TM = _pick_tile(Mp, 8, 256)

    if K <= 8192:                       # single K block, full lane extent
        Kp, TK = K, K
    else:
        Kp = _round_up(K, 512)
        TK = 512
        a = jnp.pad(a, ((0, 0), (0, Kp - K)))
        b = jnp.pad(b, ((0, Kp - K), (0, 0)))

    if N <= 512:                        # full N block, no padded output lanes
        Np, TN = N, N
    else:
        Np = _round_up(N, 128)
        TN = _pick_tile(Np, 128, 256)
        b = jnp.pad(b, ((0, 0), (0, Np - N)))

    if addend is None:
        kind, args = 0, (a, b)
    else:
        addend = addend.astype(jnp.float32)
        if addend.ndim == 1:
            kind = 1
            ad = addend.reshape(1, N)
            if Np != N:
                ad = jnp.pad(ad, ((0, 0), (0, Np - N)))
        else:
            kind = 2
            ad = addend
            if Mp != M or Np != N:
                ad = jnp.pad(ad, ((0, Mp - M), (0, Np - N)))
        args = (a, b, ad)

    out = _matmul_call(Mp, Kp, Np, TM, TK, TN, kind)(*args)
    if Mp != M or Np != N:
        out = out[:M, :N]
    return out


# ----------------------------------------------------------------------------
# GroupNorm (+ optional ReLU): channels-last, two tiled Pallas passes.
# ----------------------------------------------------------------------------
def _gn_stats_kernel(x_ref, o_ref):
    x = x_ref[0]                                        # (TL, C)
    o_ref[0, 0, 0:1, :] = jnp.sum(x, axis=0, keepdims=True)
    o_ref[0, 0, 1:2, :] = jnp.sum(x * x, axis=0, keepdims=True)


def _gn_norm_kernel(x_ref, sc_ref, sh_ref, o_ref, *, relu):
    x = x_ref[0]                                        # (TL, C)
    y = x * sc_ref[0] + sh_ref[0]                       # (1, C) broadcasts
    if relu:
        y = jnp.maximum(y, 0.0)
    o_ref[0] = y


@functools.lru_cache(maxsize=None)
def _gn_stats_call(N, nL, TL, C):
    return pl.pallas_call(
        _gn_stats_kernel,
        out_shape=jax.ShapeDtypeStruct((N, nL, 2, C), jnp.float32),
        grid_spec=pltpu.PrefetchScalarGridSpec(
            num_scalar_prefetch=0,
            grid=(N, nL),
            in_specs=[pl.BlockSpec((1, TL, C), lambda n, l: (n, l, 0))],
            out_specs=pl.BlockSpec((1, 1, 2, C), lambda n, l: (n, l, 0, 0))),
        compiler_params=pltpu.CompilerParams(
            dimension_semantics=("parallel", "parallel")))


@functools.lru_cache(maxsize=None)
def _gn_norm_call(N, nL, TL, C, relu):
    return pl.pallas_call(
        functools.partial(_gn_norm_kernel, relu=relu),
        out_shape=jax.ShapeDtypeStruct((N, nL * TL, C), jnp.float32),
        grid_spec=pltpu.PrefetchScalarGridSpec(
            num_scalar_prefetch=0,
            grid=(N, nL),
            in_specs=[pl.BlockSpec((1, TL, C), lambda n, l: (n, l, 0)),
                      pl.BlockSpec((1, 1, C), lambda n, l: (n, 0, 0)),
                      pl.BlockSpec((1, 1, C), lambda n, l: (n, 0, 0))],
            out_specs=pl.BlockSpec((1, TL, C), lambda n, l: (n, l, 0))),
        compiler_params=pltpu.CompilerParams(
            dimension_semantics=("parallel", "parallel")))


def group_norm(x, gamma, beta, groups=8, relu=True, eps=1e-5):
    """x: (N, D, H, W, C) -> GroupNorm(groups)(x) [+ ReLU], channels-last."""
    N, D, H, W, C = x.shape
    L = D * H * W
    Cg = C // groups
    xr = x.reshape(N, L, C)

    TL = _pick_tile(L, 8, max(8, (2 << 20) // (4 * C)))
    nL = L // TL

    stats = _gn_stats_call(N, nL, TL, C)(xr)            # (N, nL, 2, C)
    sums = stats[:, :, 0, :].sum(axis=1)                # (N, C)
    sqs = stats[:, :, 1, :].sum(axis=1)                 # (N, C)
    cnt = float(L * Cg)
    gsum = sums.reshape(N, groups, Cg).sum(-1)          # (N, groups)
    gsq = sqs.reshape(N, groups, Cg).sum(-1)
    mean = gsum / cnt
    var = jnp.maximum(gsq / cnt - mean * mean, 0.0)
    rstd = lax.rsqrt(var + eps)
    mean_c = jnp.repeat(mean, Cg, axis=1)               # (N, C)
    rstd_c = jnp.repeat(rstd, Cg, axis=1)
    scale = rstd_c * gamma[None, :]
    shift = beta[None, :] - mean_c * scale

    y = _gn_norm_call(N, nL, TL, C, relu)(
        xr, scale.reshape(N, 1, C), shift.reshape(N, 1, C))
    return y.reshape(N, D, H, W, C)


# ----------------------------------------------------------------------------
# Elementwise Pallas kernels (residual add, attention gate), tiled lane-dense.
# ----------------------------------------------------------------------------
def _add_kernel(a_ref, b_ref, o_ref):
    o_ref[...] = a_ref[...] + b_ref[...]


def _attn_kernel(a_ref, b_ref, o_ref):
    o_ref[...] = a_ref[...] * (1.0 + jax.nn.sigmoid(b_ref[...]))


_EW_KERNELS = {"add": _add_kernel, "attn": _attn_kernel}


@functools.lru_cache(maxsize=None)
def _ew_call(name, rows, cols, tr):
    return pl.pallas_call(
        _EW_KERNELS[name],
        out_shape=jax.ShapeDtypeStruct((rows, cols), jnp.float32),
        grid_spec=pltpu.PrefetchScalarGridSpec(
            num_scalar_prefetch=0,
            grid=(rows // tr,),
            in_specs=[pl.BlockSpec((tr, cols), lambda i: (i, 0))] * 2,
            out_specs=pl.BlockSpec((tr, cols), lambda i: (i, 0))),
        compiler_params=pltpu.CompilerParams(
            dimension_semantics=("parallel",)))


def _elementwise(name, a, b):
    shape = a.shape
    n = int(np.prod(shape))
    cols = _pick_tile(n, 128, 2048)
    rows = n // cols
    tr = _pick_tile(rows, 8, max(8, (1 << 18) // max(cols, 1)))
    out = _ew_call(name, rows, cols, tr)(
        a.astype(jnp.float32).reshape(rows, cols),
        b.astype(jnp.float32).reshape(rows, cols))
    return out.reshape(shape)


# ----------------------------------------------------------------------------
# ConResAtt depth residual: |sigmoid(x[d]) - sigmoid(x[d-1])|, zero at d == 0.
# Mask computed in-kernel from a broadcasted iota (no mask tensor in HBM).
# ----------------------------------------------------------------------------
def _sigres_kernel(a_ref, b_ref, o_ref, *, depth):
    s = jax.nn.sigmoid(a_ref[...])
    sp = jax.nn.sigmoid(b_ref[...])
    row = lax.broadcasted_iota(jnp.int32, a_ref.shape, 0)
    mask = (row % depth) != 0
    o_ref[...] = jnp.where(mask, jnp.abs(s - sp), 0.0)


@functools.lru_cache(maxsize=None)
def _sigres_call(rows, cols, tc, depth):
    return pl.pallas_call(
        functools.partial(_sigres_kernel, depth=depth),
        out_shape=jax.ShapeDtypeStruct((rows, cols), jnp.float32),
        grid_spec=pltpu.PrefetchScalarGridSpec(
            num_scalar_prefetch=0,
            grid=(cols // tc,),
            in_specs=[pl.BlockSpec((rows, tc), lambda j: (0, j))] * 2,
            out_specs=pl.BlockSpec((rows, tc), lambda j: (0, j))),
        compiler_params=pltpu.CompilerParams(
            dimension_semantics=("parallel",)))


def con_res(x1):
    N, D, H, W, C = x1.shape
    xs = jnp.concatenate([jnp.zeros_like(x1[:, :1]), x1[:, :-1]], axis=1)
    rows, cols = N * D, H * W * C
    tc = _pick_tile(cols, 128, 2048)
    out = _sigres_call(rows, cols, tc, D)(
        x1.reshape(rows, cols), xs.reshape(rows, cols))
    return out.reshape(x1.shape)


# ----------------------------------------------------------------------------
# Conv3d via im2col (bf16) + Pallas matmul, with optional fused bias/residual.
# Weights are stored pre-reshaped (K, Cout) in bf16.
# ----------------------------------------------------------------------------
def conv3d(x, wd, stride=(1, 1, 1), padding=(1, 1, 1), dilation=(1, 1, 1),
           bias=None, addend=None):
    w2d = wd["w"]
    kd, kh, kw = wd["ks"]
    N, D, H, W, C = x.shape
    K, Cout = w2d.shape
    assert K == kd * kh * kw * C
    pd, ph, pw = padding
    sd, sh, sw = stride
    dd, dh, dw = dilation
    Do = (D + 2 * pd - dd * (kd - 1) - 1) // sd + 1
    Ho = (H + 2 * ph - dh * (kh - 1) - 1) // sh + 1
    Wo = (W + 2 * pw - dw * (kw - 1) - 1) // sw + 1

    xb = x.astype(jnp.bfloat16)
    if (kd, kh, kw) == (1, 1, 1) and stride == (1, 1, 1) and padding == (0, 0, 0):
        A = xb.reshape(N * D * H * W, C)
    else:
        xp = jnp.pad(xb, ((0, 0), (pd, pd), (ph, ph), (pw, pw), (0, 0)))
        cols = []
        for i in range(kd):
            for j in range(kh):
                for k in range(kw):
                    sl = xp[:,
                            i * dd: i * dd + (Do - 1) * sd + 1: sd,
                            j * dh: j * dh + (Ho - 1) * sh + 1: sh,
                            k * dw: k * dw + (Wo - 1) * sw + 1: sw,
                            :]
                    cols.append(sl)
        A = jnp.concatenate(cols, axis=-1).reshape(N * Do * Ho * Wo, K)

    ad = None
    if addend is not None:
        assert addend.shape == (N, Do, Ho, Wo, Cout)
        ad = addend.reshape(N * Do * Ho * Wo, Cout).astype(jnp.float32)
    if bias is not None:
        ad = bias.astype(jnp.float32) if ad is None else ad + bias[None, :]

    out = pallas_matmul(A, w2d, addend=ad)
    return out.reshape(N, Do, Ho, Wo, Cout)


# ----------------------------------------------------------------------------
# Trilinear interpolation (align_corners=True): separable 2-tap lerp kernel.
# ----------------------------------------------------------------------------
def _lerp_kernel(a_ref, b_ref, f_ref, o_ref):
    a = a_ref[...]
    o_ref[...] = a + (b_ref[...] - a) * f_ref[...]


@functools.lru_cache(maxsize=None)
def _lerp_call(rows, cols, tr, tc):
    return pl.pallas_call(
        _lerp_kernel,
        out_shape=jax.ShapeDtypeStruct((rows, cols), jnp.float32),
        grid_spec=pltpu.PrefetchScalarGridSpec(
            num_scalar_prefetch=0,
            grid=(rows // tr, cols // tc),
            in_specs=[pl.BlockSpec((tr, tc), lambda i, j: (i, j)),
                      pl.BlockSpec((tr, tc), lambda i, j: (i, j)),
                      pl.BlockSpec((tr, 1), lambda i, j: (i, 0))],
            out_specs=pl.BlockSpec((tr, tc), lambda i, j: (i, j))),
        compiler_params=pltpu.CompilerParams(
            dimension_semantics=("parallel", "parallel")))


def _interp_axis(x, axis, out_size):
    in_size = x.shape[axis]
    if in_size == out_size:
        return x
    if out_size == 1:
        coords = np.zeros((1,), np.float64)
    else:
        coords = np.arange(out_size, dtype=np.float64) * (in_size - 1) / (out_size - 1)
    lo = np.clip(np.floor(coords).astype(np.int64), 0, in_size - 1)
    hi = np.minimum(lo + 1, in_size - 1)
    frac = (coords - lo).astype(np.float32)

    x_lo = jnp.take(x, jnp.asarray(lo.astype(np.int32)), axis=axis)
    x_hi = jnp.take(x, jnp.asarray(hi.astype(np.int32)), axis=axis)

    prefix = int(np.prod(x.shape[:axis]))
    suffix = int(np.prod(x.shape[axis + 1:]))
    rows, cols = prefix * out_size, suffix
    fr = jnp.asarray(np.tile(frac, prefix).reshape(rows, 1))

    tr = _pick_tile(rows, 8, max(8, (1 << 18) // max(cols, 1)))
    tc = _pick_tile(cols, 128, 2048)
    out2 = _lerp_call(rows, cols, tr, tc)(
        x_lo.astype(jnp.float32).reshape(rows, cols),
        x_hi.astype(jnp.float32).reshape(rows, cols), fr)
    return out2.reshape(x.shape[:axis] + (out_size,) + x.shape[axis + 1:])


def trilinear(x, size):
    """x: (N, D, H, W, C) resized to (N, size[0], size[1], size[2], C)."""
    x = _interp_axis(x, 1, size[0])
    x = _interp_axis(x, 2, size[1])
    x = _interp_axis(x, 3, size[2])
    return x


# ----------------------------------------------------------------------------
# Model pieces
# ----------------------------------------------------------------------------
def nobottleneck(p, x, stride=(1, 1, 1), dilation=(1, 1, 1)):
    residual = x
    out = group_norm(x, p["gn1_g"], p["gn1_b"], relu=True)
    out = conv3d(out, p["conv1"], stride=stride, padding=dilation,
                 dilation=dilation)
    out = group_norm(out, p["gn2_g"], p["gn2_b"], relu=True)
    # residual add fused into the matmul epilogue
    out = conv3d(out, p["conv2"], stride=(1, 1, 1), padding=dilation,
                 dilation=dilation, addend=residual)
    return out


def down_block(p, x, stride):
    x = group_norm(x, p["gn_g"], p["gn_b"], relu=True)
    return conv3d(x, p["conv"], stride=stride, padding=(1, 1, 1))


def conresatt(p, x1, x2, in_planes, out_planes, first_layer):
    x1 = group_norm(x1, p["gn_seg_g"], p["gn_seg_b"], relu=True)
    x1 = conv3d(x1, p["conv_seg"], padding=(1, 1, 1))
    res = con_res(x1)
    res = conv3d(res, p["conv_res"], padding=(0, 0, 0))
    if first_layer:
        x2 = conv3d(x2, p["conv_mp_first"], padding=(1, 1, 1), addend=res)
    elif in_planes != out_planes:
        x2 = group_norm(x2, p["gn_mp_g"], p["gn_mp_b"], relu=True)
        x2 = conv3d(x2, p["conv_mp"], padding=(1, 1, 1), addend=res)
    else:
        x2 = _elementwise("add", x2, res)
    x2 = group_norm(x2, p["gn_res1_g"], p["gn_res1_b"], relu=True)
    x2 = conv3d(x2, p["conv_res1"], padding=(1, 1, 1))
    x1 = _elementwise("attn", x1, x2)
    return x1, x2


# ----------------------------------------------------------------------------
# Parameter init (deterministic, synthetic); weights pre-reshaped + bf16.
# The model uses weight_std=False (constructor default), so the weight-
# standardized Conv3d path is not exercised.
# ----------------------------------------------------------------------------
def init_params(key, in_channels, num_classes, layers):
    cnt = [0]

    def nk():
        cnt[0] += 1
        return jax.random.fold_in(key, cnt[0])

    def conv_p(cin, cout, ks=(3, 3, 3)):
        fan_in = cin * ks[0] * ks[1] * ks[2]
        w = (jax.random.normal(nk(), ks + (cin, cout), jnp.float32)
             / np.sqrt(fan_in))
        return {"w": w.reshape(fan_in, cout).astype(jnp.bfloat16), "ks": ks}

    def gn(c):
        return jnp.ones((c,), jnp.float32), jnp.zeros((c,), jnp.float32)

    def block_p(cin, cout):
        g1, b1 = gn(cin)
        g2, b2 = gn(cout)
        return {"gn1_g": g1, "gn1_b": b1, "conv1": conv_p(cin, cout),
                "gn2_g": g2, "gn2_b": b2, "conv2": conv_p(cout, cout)}

    def down_p(cin, cout):
        g, b = gn(cin)
        return {"gn_g": g, "gn_b": b, "conv": conv_p(cin, cout)}

    def att_p(in_ch, inp, outp, first):
        gs, bs = gn(inp)
        g1, b1 = gn(outp)
        d = {"gn_seg_g": gs, "gn_seg_b": bs,
             "conv_seg": conv_p(inp, outp),
             "conv_res": conv_p(outp, outp, (1, 1, 1)),
             "gn_res1_g": g1, "gn_res1_b": b1,
             "conv_res1": conv_p(outp, outp)}
        # gn_res / gn_res2 / conv_res2 exist in the module but are unused in forward.
        if first:
            d["conv_mp_first"] = conv_p(in_ch, outp)
        elif inp != outp:
            gm, bm = gn(inp)
            d.update({"gn_mp_g": gm, "gn_mp_b": bm, "conv_mp": conv_p(inp, outp)})
        return d

    def cls_p(cin, cout):
        return {"conv": conv_p(cin, cout, (1, 1, 1)),
                "b": jnp.zeros((cout,), jnp.float32)}

    return {
        "conv_4_32": conv_p(in_channels, 32),
        "layer0": [block_p(32, 32) for _ in range(layers[0])],
        "conv_32_64": down_p(32, 64),
        "layer1": [block_p(64, 64) for _ in range(layers[1])],
        "conv_64_128": down_p(64, 128),
        "layer2": [block_p(128, 128) for _ in range(layers[2])],
        "conv_128_256": down_p(128, 256),
        "layer3": [block_p(256, 256) for _ in range(layers[3])],
        "layer4": [block_p(256, 256) for _ in range(layers[4])],
        "fusion": down_p(256, 128),
        "seg_x4": att_p(in_channels, 128, 64, True),
        "seg_x2": att_p(in_channels, 64, 32, False),
        "seg_x1": att_p(in_channels, 32, 32, False),
        "seg_cls": cls_p(32, num_classes),
        "res_cls": cls_p(32, num_classes),
        "resx2_cls": cls_p(32, num_classes),
        "resx4_cls": cls_p(64, num_classes),
    }


# ----------------------------------------------------------------------------
# Forward pass
# ----------------------------------------------------------------------------
def conresnet_forward(P, x_ncdhw, xres_ncdhw, shape):
    to_ndhwc = lambda t: jnp.transpose(t, (0, 2, 3, 4, 1))
    to_ncdhw = lambda t: jnp.transpose(t, (0, 4, 1, 2, 3))

    x = to_ndhwc(x_ncdhw.astype(jnp.float32))
    x_res = to_ndhwc(xres_ncdhw.astype(jnp.float32))

    x = conv3d(x, P["conv_4_32"], padding=(1, 1, 1))
    for bp in P["layer0"]:
        x = nobottleneck(bp, x)
    skip1 = x
    x = down_block(P["conv_32_64"], x, (2, 2, 2))
    for bp in P["layer1"]:
        x = nobottleneck(bp, x)
    skip2 = x
    x = down_block(P["conv_64_128"], x, (2, 2, 2))
    for bp in P["layer2"]:
        x = nobottleneck(bp, x)
    skip3 = x
    x = down_block(P["conv_128_256"], x, (2, 2, 2))
    for bp in P["layer3"]:
        x = nobottleneck(bp, x)
    for bp in P["layer4"]:
        x = nobottleneck(bp, x, dilation=(2, 2, 2))

    # fusionConv -- Dropout3d(0.1) is identity in eval mode.
    x = group_norm(x, P["fusion"]["gn_g"], P["fusion"]["gn_b"], relu=True)
    x = conv3d(x, P["fusion"]["conv"], padding=(1, 1, 1))

    s4 = (shape[0] // 4, shape[1] // 4, shape[2] // 4)
    s2 = (shape[0] // 2, shape[1] // 2, shape[2] // 2)
    s1 = (shape[0], shape[1], shape[2])

    res_x4 = trilinear(x_res, s4)
    seg_x4 = trilinear(x, s4)
    seg_x4 = _elementwise("add", seg_x4, skip3)
    seg_x4, res_x4 = conresatt(P["seg_x4"], seg_x4, res_x4, 128, 64, True)

    res_x2 = trilinear(res_x4, s2)
    seg_x2 = trilinear(seg_x4, s2)
    seg_x2 = _elementwise("add", seg_x2, skip2)
    seg_x2, res_x2 = conresatt(P["seg_x2"], seg_x2, res_x2, 64, 32, False)

    res_x1 = trilinear(res_x2, s1)
    seg_x1 = trilinear(seg_x2, s1)
    seg_x1 = _elementwise("add", seg_x1, skip1)
    seg_x1, res_x1 = conresatt(P["seg_x1"], seg_x1, res_x1, 32, 32, False)

    seg = conv3d(seg_x1, P["seg_cls"]["conv"], padding=(0, 0, 0),
                 bias=P["seg_cls"]["b"])
    res = conv3d(res_x1, P["res_cls"]["conv"], padding=(0, 0, 0),
                 bias=P["res_cls"]["b"])
    resx2 = conv3d(res_x2, P["resx2_cls"]["conv"], padding=(0, 0, 0),
                   bias=P["resx2_cls"]["b"])
    resx4 = conv3d(res_x4, P["resx4_cls"]["conv"], padding=(0, 0, 0),
                   bias=P["resx4_cls"]["b"])
    resx2 = trilinear(resx2, s1)
    resx4 = trilinear(resx4, s1)

    return [to_ncdhw(seg), to_ncdhw(res), to_ncdhw(resx2), to_ncdhw(resx4)]


# ----------------------------------------------------------------------------
# Main
# ----------------------------------------------------------------------------
if __name__ == "__main__":
    key = jax.random.PRNGKey(0)
    in_channels = 1
    num_classes = 2
    shape = (16, 16, 16)          # input D, H, W
    layers = [1, 1, 1, 1, 1]
    batch = 1

    params = init_params(key, in_channels, num_classes, layers)

    kx, kr = jax.random.split(jax.random.fold_in(key, 12345))
    x = jax.random.normal(kx, (batch, in_channels) + shape, jnp.float32)
    x_res = jax.random.normal(kr, (batch, in_channels) + shape, jnp.float32)

    outs = conresnet_forward(params, x, x_res, shape)
    outs = jax.block_until_ready(outs)

    expected = (batch, num_classes) + shape
    assert all(o.shape == expected for o in outs), [o.shape for o in outs]
    assert all(bool(jnp.isfinite(o).all()) for o in outs)

    print("KERNEL_OK")
</pallas_src>

<mosaic_0001>
module attributes {stable_mosaic.version = 11 : i64} {
  func.func @_matmul_kernel(%arg0: i32, %arg1: i32, %arg2: i32, %arg3: memref<256x27xbf16, #tpu.memory_space<vmem>>, %arg4: memref<27x32xbf16, #tpu.memory_space<vmem>>, %arg5: memref<256x32xf32, #tpu.memory_space<vmem>>, %arg6: memref<256x32xf32, #tpu.memory_space<vmem>>) attributes {dimension_semantics = [#tpu.dimension_semantics<parallel>, #tpu.dimension_semantics<parallel>, #tpu.dimension_semantics<arbitrary>], iteration_bounds = array<i64: 16, 1, 1>, scalar_prefetch = 0 : i64, scratch_operands = 1 : i64, tpu.core_type = #tpu.core_type<tc>, window_params = [{transform_indices = @transform_0, window_bounds = array<i64: 256, 27>}, {transform_indices = @transform_1, window_bounds = array<i64: 27, 32>}, {transform_indices = @transform_2, window_bounds = array<i64: 256, 32>}]} {
    %c0_i32 = arith.constant 0 : i32
    %0 = arith.cmpi eq, %arg2, %c0_i32 : i32
    %1 = arith.extui %0 : i1 to i32
    %c0_i32_0 = arith.constant 0 : i32
    %2 = arith.cmpi ne, %1, %c0_i32_0 : i32
    scf.if %2 {
      %cst_10 = arith.constant 0.000000e+00 : f32
      %12 = vector.broadcast %cst_10 : f32 to vector<256x32xf32>
      %c0_11 = arith.constant 0 : index
      %c0_12 = arith.constant 0 : index
      %13 = vector.load %arg6[%c0_11, %c0_12] : memref<256x32xf32, #tpu.memory_space<vmem>>, vector<256x32xf32>
      tpu.vector_store %arg6[%c0_11, %c0_12], %12 {strides = array<i32>} : memref<256x32xf32, #tpu.memory_space<vmem>>, vector<256x32xf32>,
    } else {
    }
    %c0 = arith.constant 0 : index
    %c0_1 = arith.constant 0 : index
    %3 = vector.load %arg6[%c0, %c0_1] : memref<256x32xf32, #tpu.memory_space<vmem>>, vector<256x32xf32>
    %c0_2 = arith.constant 0 : index
    %c0_3 = arith.constant 0 : index
    %4 = vector.load %arg3[%c0_2, %c0_3] : memref<256x27xbf16, #tpu.memory_space<vmem>>, vector<256x27xbf16>
    %c0_4 = arith.constant 0 : index
    %c0_5 = arith.constant 0 : index
    %5 = vector.load %arg4[%c0_4, %c0_5] : memref<27x32xbf16, #tpu.memory_space<vmem>>, vector<27x32xbf16>
    %cst = arith.constant dense<0.000000e+00> : vector<256x32xf32>
    %6 = tpu.matmul %4, %5, %cst {dimension_numbers = #tpu.dot_dimension_numbers<[1], [0], [0], [1], [0, 0, 1, 1], [], []>} : vector<256x27xbf16>, vector<27x32xbf16>, vector<256x32xf32> -> vector<256x32xf32>
    %7 = arith.addf %3, %6 : vector<256x32xf32>
    %c0_6 = arith.constant 0 : index
    %c0_7 = arith.constant 0 : index
    %8 = vector.load %arg6[%c0_6, %c0_7] : memref<256x32xf32, #tpu.memory_space<vmem>>, vector<256x32xf32>
    tpu.vector_store %arg6[%c0_6, %c0_7], %7 {strides = array<i32>} : memref<256x32xf32, #tpu.memory_space<vmem>>, vector<256x32xf32>,
    %c0_i32_8 = arith.constant 0 : i32
    %9 = arith.cmpi eq, %arg2, %c0_i32_8 : i32
    %10 = arith.extui %9 : i1 to i32
    %c0_i32_9 = arith.constant 0 : i32
    %11 = arith.cmpi ne, %10, %c0_i32_9 : i32
    scf.if %11 {
      %c0_10 = arith.constant 0 : index
      %c0_11 = arith.constant 0 : index
      %12 = vector.load %arg6[%c0_10, %c0_11] : memref<256x32xf32, #tpu.memory_space<vmem>>, vector<256x32xf32>
      %c0_12 = arith.constant 0 : index
      %c0_13 = arith.constant 0 : index
      %13 = vector.load %arg5[%c0_12, %c0_13] : memref<256x32xf32, #tpu.memory_space<vmem>>, vector<256x32xf32>
      tpu.vector_store %arg5[%c0_12, %c0_13], %12 {strides = array<i32>} : memref<256x32xf32, #tpu.memory_space<vmem>>, vector<256x32xf32>,
    } else {
    }
    return
  }
  func.func @transform_0(%arg0: i32, %arg1: i32, %arg2: i32) -> (i32, i32) {
    %c0_i32 = arith.constant 0 : i32
    return %arg0, %arg2 : i32, i32
  }
  func.func @transform_1(%arg0: i32, %arg1: i32, %arg2: i32) -> (i32, i32) {
    %c0_i32 = arith.constant 0 : i32
    return %arg2, %arg1 : i32, i32
  }
  func.func @transform_2(%arg0: i32, %arg1: i32, %arg2: i32) -> (i32, i32) {
    %c0_i32 = arith.constant 0 : i32
    return %arg0, %arg1 : i32, i32
  }
}

</mosaic_0001>

<bundles_post_ra>
// kernel: tpu_custom_call.1
= control target key start
LH: loop header
LB: loop body
LE: loop exit
PB: predicated region body
PF: predicated region fallthrough
CT: control target
= control target key end

     0   :  { %7 = vsyncpa [#allocation4], 0  ;;  %s1027_s9 = smov 0   ;;  %s1029_s10 = smov 0   ;;  %s1235_s0 = inlined_call_operand.vmem [shape: bf16[4096,27], index: 0, kind: input, shape index: {}]   ;;  %s1236_s1 = inlined_call_operand.hbm [shape: bf16[27,32], index: 1, kind: input, shape index: {}]   ;;  %s1237_s2 = inlined_call_operand.vmem [shape: f32[4096,32], index: 2, kind: output, shape index: {}]  }
   0x1   :  { %s1031_s11 = smov 0  }
   0x2 LB: > { %s785_s12 = sadd.s32 4294967295, %s1005_s11   ;;  %s32_s13 = sadd.s32 1, %s1001_s10  ;;  %s1005_s11 = sphi %s1031_s11, %s13_s11   ;;  %s1001_s10 = sphi %s1029_s10, %s1239_s10   ;;  %s997_s9 = sphi %s1027_s9, %s1238_s9  }
   0x3   : > { %p34_p0 = scmp.ge.s32.totalorder %s32_s13, 16  ;;  %p787_p1 = scmp.ge.s32.totalorder %s1005_s11, 1 }
   0x4   : > { %p121_p2 = scmp.lt.s32.totalorder %s1005_s11, 17  ;;  %p918_p4 = scmp.eq.s32.totalorder %s785_s12, 0 }
   0x5   : > { %s1241_s13 = smov (%p34_p0, %s32_s13), 0  ;;  %s136_s16 = sshll.u32 %s1236_s1, 4  ;;  %s137_s16 = int_to_ptr.hbm [resolvable:$true] %s136_s16 }
   0x6   : > { %p122_p3 = pnand %p787_p1, %p121_p2  ;;  %s1007_s17 = smov [#allocation3]  }
   0x7   : > { %s138_s18 = sshll.u32 %s1007_s17, 4  ;;  %s1008_s19 = smov 64   ;;  %s139_s18 = int_to_ptr.vmem [resolvable:$true] %s138_s18 }
   0x8   : > { %p914_p5 = pneg %p122_p3  ;;  %s1009_s20 = smov 4  }
   0x9   : > { %166 = sbr.rel (%p122_p3) target bundleno = 230 (0xe6), region = 28 }
   0xa   : > { %p915_p6 = pnand %p918_p4, %p914_p5 }
   0xc   : > { %917 = dma.hbm_to_vmem [thread:$0]  (!%p915_p6), %s137_s16, 256, %s139_s18, [#allocation4], %s1008_s19, %s1008_s19, %s1009_s20  }
   0xe   : > { %992 = dma.done.wait (%p918_p4), [#allocation4], 256  }
   0xf   : > { %994 = vsyncadd (%p918_p4), [#allocation4], 4294967040  ;;  %s792_s21 = sshll.u32 %s997_s9, 5  ;;  %vm460_vm0 = vcmask 1044480   ;;  %vm461_vm1 = vcmask 1045504   ;;  %v1010_v0 = vmov 65535  }
  0x10   : > { %p196_p7 = scmp.lt.s32.totalorder %s792_s21, 511  ;;  %v462_v1 = vsel %vm460_vm0, 4294967295, %v1010_v0  ;;  %v866_v2 = vld [vmem:[#allocation3 + $0x8] sm:$0xf]  ;;  %v903_v3 = vld [vmem:[#allocation3 + $0x8] sm:$0x30] }
  0x11   : > { %v463_v4 = vsel %vm461_vm1, %v462_v1, 0  ;;  %v867_v5 = vor.u32 %v903_v3, %v866_v2  ;;  %v902_v7 = vld [vmem:[#allocation3] sm:$0xff]  ;;  %vm411_vm2 = vcmask 220160   ;;  %vm219_vm3 = vcmask 261120  }
  0x12   : > { %s1243_s21 = smov (!%p196_p7, %s792_s21), 511  ;;  %v1011_v16 = vmov 0.0  }
  0x13   : > { %s793_s22 = sshll.u32 %s1243_s21, 2  ;;  %v465_v6 = vand.u32 %v867_v5, %v463_v4  ;;  %220 = vst.msk [vmem:[#allocation2] sm:$0xff] %vm219_vm3, %v1011_v16  ;;  %s795_s26 = sshll.u32 %s1243_s21, 3 }
  0x14   : > { %s1058_s25 = scalar_lea.vmem %s1235_s0, %s793_s22  ;;  %221 = vst.msk [vmem:[#allocation2 + $0x8] sm:$0xff] %vm219_vm3, %v1011_v16  ;;  %s1130_s29 = scalar_lea.vmem %s1237_s2, %s795_s26 }
  0x15   : > { %473 = vmatpush.bf16.msra.mxu0 %v465_v6  ;;  %904 = vmatpush.bf16.msra.mxu1 %v465_v6  ;;  %v886_v8 = vld [vmem:[%s1058_s25] sm:$0xff]  ;;  %v887_v12 = vld [vmem:[%s1058_s25 + $0x8] sm:$0xff]  ;;  %222 = vst.msk [vmem:[#allocation2 + $0x10] sm:$0xff] %vm219_vm3, %v1011_v16  ;;  %v888_v17 = vld [vmem:[%s1058_s25 + $0x10] sm:$0xff] }
  0x16   : > { %905 = vmatpush.bf16.msra.mxu2 %v465_v6  ;;  %906 = vmatpush.bf16.msra.mxu3 %v465_v6  ;;  %v890_v9 = vld [vmem:[%s1058_s25 + $0x20] sm:$0xff]  ;;  %v891_v13 = vld [vmem:[%s1058_s25 + $0x28] sm:$0xff]  ;;  %223 = vst.msk [vmem:[#allocation2 + $0x18] sm:$0xff] %vm219_vm3, %v1011_v16  ;;  %v892_v18 = vld [vmem:[%s1058_s25 + $0x30] sm:$0xff] }
  0x17   : > { %v894_v10 = vld [vmem:[%s1058_s25 + $0x40] sm:$0xff]  ;;  %v895_v14 = vld [vmem:[%s1058_s25 + $0x48] sm:$0xff]  ;;  %224 = vst.msk [vmem:[#allocation2 + $0x20] sm:$0xff] %vm219_vm3, %v1011_v16  ;;  %v896_v19 = vld [vmem:[%s1058_s25 + $0x50] sm:$0xff] }
  0x18   : > { %v898_v11 = vld [vmem:[%s1058_s25 + $0x60] sm:$0xff]  ;;  %v899_v15 = vld [vmem:[%s1058_s25 + $0x68] sm:$0xff]  ;;  %225 = vst.msk [vmem:[#allocation2 + $0x28] sm:$0xff] %vm219_vm3, %v1011_v16  ;;  %v900_v20 = vld [vmem:[%s1058_s25 + $0x70] sm:$0xff] }
  0x19   : > { %474 = vmatpush.bf16.msra.mxu0 %v902_v7  ;;  %907 = vmatpush.bf16.msra.mxu1 %v902_v7  ;;  %226 = vst.msk [vmem:[#allocation2 + $0x30] sm:$0xff] %vm219_vm3, %v1011_v16  ;;  %v889_v21 = vld [vmem:[%s1058_s25 + $0x18] sm:$0xff] }
  0x1a   : > { %908 = vmatpush.bf16.msra.mxu2 %v902_v7  ;;  %909 = vmatpush.bf16.msra.mxu3 %v902_v7  ;;  %227 = vst.msk [vmem:[#allocation2 + $0x38] sm:$0xff] %vm219_vm3, %v1011_v16  ;;  %v893_v22 = vld [vmem:[%s1058_s25 + $0x38] sm:$0xff]  ;;  %v252_v25 = vld [vmem:[#allocation2] sm:$0xff] }
  0x1b   : > { %228 = vst.msk [vmem:[#allocation2 + $0x40] sm:$0xff] %vm219_vm3, %v1011_v16  ;;  %v897_v23 = vld [vmem:[%s1058_s25 + $0x58] sm:$0xff]  ;;  %v253_v35 = vld [vmem:[#allocation2 + $0x8] sm:$0xff] }
  0x1c   : > { %868 = vmatmul.msk.bf16.vlgmr.msra.gmra.mxu0 %vm411_vm2, %v886_v8  ;;  %872 = vmatmul.msk.bf16.vlgmr.msra.gmra.mxu1 %vm411_vm2, %v890_v9  ;;  %229 = vst.msk [vmem:[#allocation2 + $0x48] sm:$0xff] %vm219_vm3, %v1011_v16  ;;  %v901_v24 = vld [vmem:[%s1058_s25 + $0x78] sm:$0xff]  ;;  %v254_v54 = vld [vmem:[#allocation2 + $0x10] sm:$0xff] }
  0x1d   : > { %876 = vmatmul.msk.bf16.vlgmr.msra.gmra.mxu2 %vm411_vm2, %v894_v10  ;;  %880 = vmatmul.msk.bf16.vlgmr.msra.gmra.mxu3 %vm411_vm2, %v898_v11  ;;  %230 = vst.msk [vmem:[#allocation2 + $0x50] sm:$0xff] %vm219_vm3, %v1011_v16  ;;  %v255_v1 = vld [vmem:[#allocation2 + $0x18] sm:$0xff] }
  0x1e   : > { %231 = vst.msk [vmem:[#allocation2 + $0x58] sm:$0xff] %vm219_vm3, %v1011_v16 }
  0x1f   : > { %232 = vst.msk [vmem:[#allocation2 + $0x60] sm:$0xff] %vm219_vm3, %v1011_v16 }
  0x20   : > { %233 = vst.msk [vmem:[#allocation2 + $0x68] sm:$0xff] %vm219_vm3, %v1011_v16 }
  0x21   : > { %234 = vst.msk [vmem:[#allocation2 + $0x70] sm:$0xff] %vm219_vm3, %v1011_v16 }
  0x22   : > { %235 = vst.msk [vmem:[#allocation2 + $0x78] sm:$0xff] %vm219_vm3, %v1011_v16  ;;  %v260_v26 = vld [vmem:[#allocation2 + $0x40] sm:$0xff] }
  0x23   : > { %236 = vst.msk [vmem:[#allocation2 + $0x80] sm:$0xff] %vm219_vm3, %v1011_v16  ;;  %v261_v38 = vld [vmem:[#allocation2 + $0x48] sm:$0xff] }
  0x24   : > { %237 = vst.msk [vmem:[#allocation2 + $0x88] sm:$0xff] %vm219_vm3, %v1011_v16  ;;  %v262_v55 = vld [vmem:[#allocation2 + $0x50] sm:$0xff] }
  0x25   : > { %238 = vst.msk [vmem:[#allocation2 + $0x90] sm:$0xff] %vm219_vm3, %v1011_v16  ;;  %v263_v4 = vld [vmem:[#allocation2 + $0x58] sm:$0xff] }
  0x26   : > { %239 = vst.msk [vmem:[#allocation2 + $0x98] sm:$0xff] %vm219_vm3, %v1011_v16 }
  0x27   : > { %240 = vst.msk [vmem:[#allocation2 + $0xa0] sm:$0xff] %vm219_vm3, %v1011_v16 }
  0x28   : > { %241 = vst.msk [vmem:[#allocation2 + $0xa8] sm:$0xff] %vm219_vm3, %v1011_v16 }
  0x29   : > { %242 = vst.msk [vmem:[#allocation2 + $0xb0] sm:$0xff] %vm219_vm3, %v1011_v16 }
  0x2a   : > { %243 = vst.msk [vmem:[#allocation2 + $0xb8] sm:$0xff] %vm219_vm3, %v1011_v16  ;;  %v268_v31 = vld [vmem:[#allocation2 + $0x80] sm:$0xff] }
  0x2b   : > { %244 = vst.msk [vmem:[#allocation2 + $0xc0] sm:$0xff] %vm219_vm3, %v1011_v16  ;;  %v269_v45 = vld [vmem:[#allocation2 + $0x88] sm:$0xff] }
  0x2c   : > { %869 = vmatmul.msk.bf16.gmra.mxu0 %vm411_vm2, %v887_v12  ;;  %873 = vmatmul.msk.bf16.gmra.mxu1 %vm411_vm2, %v891_v13  ;;  %245 = vst.msk [vmem:[#allocation2 + $0xc8] sm:$0xff] %vm219_vm3, %v1011_v16  ;;  %v270_v60 = vld [vmem:[#allocation2 + $0x90] sm:$0xff] }
  0x2d   : > { %877 = vmatmul.msk.bf16.gmra.mxu2 %vm411_vm2, %v895_v14  ;;  %881 = vmatmul.msk.bf16.gmra.mxu3 %vm411_vm2, %v899_v15  ;;  %246 = vst.msk [vmem:[#allocation2 + $0xd0] sm:$0xff] %vm219_vm3, %v1011_v16  ;;  %v271_v11 = vld [vmem:[#allocation2 + $0x98] sm:$0xff] }
  0x2e   : > { %247 = vst.msk [vmem:[#allocation2 + $0xd8] sm:$0xff] %vm219_vm3, %v1011_v16 }
  0x2f   : > { %248 = vst.msk [vmem:[#allocation2 + $0xe0] sm:$0xff] %vm219_vm3, %v1011_v16 }
  0x30   : > { %249 = vst.msk [vmem:[#allocation2 + $0xe8] sm:$0xff] %vm219_vm3, %v1011_v16 }
  0x31   : > { %250 = vst.msk [vmem:[#allocation2 + $0xf0] sm:$0xff] %vm219_vm3, %v1011_v16 }
  0x32   : > { %251 = vst.msk [vmem:[#allocation2 + $0xf8] sm:$0xff] %vm219_vm3, %v1011_v16  ;;  %v276_v32 = vld [vmem:[#allocation2 + $0xc0] sm:$0xff] }
  0x33   : > { %v277_v46 = vld [vmem:[#allocation2 + $0xc8] sm:$0xff] }
  0x34   : > { %v278_v62 = vld [vmem:[#allocation2 + $0xd0] sm:$0xff] }
  0x35   : > { %v279_v12 = vld [vmem:[#allocation2 + $0xd8] sm:$0xff] }
  0x3c   : > { %870 = vmatmul.msk.bf16.gmra.mxu0 %vm411_vm2, %v888_v17  ;;  %874 = vmatmul.msk.bf16.gmra.mxu1 %vm411_vm2, %v892_v18 }
  0x3d   : > { %878 = vmatmul.msk.bf16.gmra.mxu2 %vm411_vm2, %v896_v19  ;;  %882 = vmatmul.msk.bf16.gmra.mxu3 %vm411_vm2, %v900_v20 }
  0x4c   : > { %871 = vmatmul.msk.bf16.gmra.mxu0 %vm411_vm2, %v889_v21  ;;  %875 = vmatmul.msk.bf16.gmra.mxu1 %vm411_vm2, %v893_v22  ;;  %v256_v22 = vld [vmem:[#allocation2 + $0x20] sm:$0xff] }
  0x4d   : > { %879 = vmatmul.msk.bf16.gmra.mxu2 %vm411_vm2, %v897_v23  ;;  %883 = vmatmul.msk.bf16.gmra.mxu3 %vm411_vm2, %v901_v24  ;;  %v264_v23 = vld [vmem:[#allocation2 + $0x60] sm:$0xff] }
  0x99   : > { %v476_v27 = vpop.f32.mrf.mxu0  ;;  %v496_v28 = vpop.f32.mrf.mxu1 }
  0x9a   : > { %v556_v29 = vadd.f32 %v476_v27, %v252_v25  ;;  %v564_v30 = vadd.f32 %v496_v28, %v260_v26  ;;  %v272_v28 = vld [vmem:[#allocation2 + $0xa0] sm:$0xff] }
  0x9c   : > { %589 = vst.msk [vmem:[#allocation2] sm:$0xff] %vm219_vm3, %v556_v29 }
  0x9d   : > { %597 = vst.msk [vmem:[#allocation2 + $0x40] sm:$0xff] %vm219_vm3, %v564_v30  ;;  %v280_v30 = vld [vmem:[#allocation2 + $0xe0] sm:$0xff] }
  0xa0   : > { %v516_v33 = vpop.f32.mrf.mxu2  ;;  %v536_v34 = vpop.f32.mrf.mxu3 }
  0xa1   : > { %v572_v36 = vadd.f32 %v516_v33, %v268_v31  ;;  %v478_v37 = vpop.f32.mrf.mxu0  ;;  %v498_v39 = vpop.f32.mrf.mxu1  ;;  %v580_v40 = vadd.f32 %v536_v34, %v276_v32  ;;  %v257_v33 = vld [vmem:[#allocation2 + $0x28] sm:$0xff] }
  0xa2   : > { %v557_v42 = vadd.f32 %v478_v37, %v253_v35  ;;  %v565_v44 = vadd.f32 %v498_v39, %v261_v38 }
  0xa3   : > { %v624_v41 = vld [vmem:[#allocation2] sm:$0xff]  ;;  %605 = vst.msk [vmem:[#allocation2 + $0x80] sm:$0xff] %vm219_vm3, %v572_v36  ;;  %v265_v36 = vld [vmem:[#allocation2 + $0x68] sm:$0xff] }
  0xa4   : > { %656 = vst.msk [vmem:[%s1130_s29] sm:$0xff] %vm219_vm3, %v624_v41  ;;  %v632_v43 = vld [vmem:[#allocation2 + $0x40] sm:$0xff] }
  0xa5   : > { %664 = vst.msk [vmem:[%s1130_s29 + $0x40] sm:$0xff] %vm219_vm3, %v632_v43  ;;  %v273_v43 = vld [vmem:[#allocation2 + $0xa8] sm:$0xff] }
  0xa6   : > { %613 = vst.msk [vmem:[#allocation2 + $0xc0] sm:$0xff] %vm219_vm3, %v580_v40 }
  0xa7   : > { %590 = vst.msk [vmem:[#allocation2 + $0x8] sm:$0xff] %vm219_vm3, %v557_v42 }
  0xa8   : > { %598 = vst.msk [vmem:[#allocation2 + $0x48] sm:$0xff] %vm219_vm3, %v565_v44  ;;  %v518_v47 = vpop.f32.mrf.mxu2  ;;  %v538_v48 = vpop.f32.mrf.mxu3  ;;  %v281_v44 = vld [vmem:[#allocation2 + $0xe8] sm:$0xff] }
  0xa9   : > { %v573_v49 = vadd.f32 %v518_v47, %v269_v45  ;;  %v581_v50 = vadd.f32 %v538_v48, %v277_v46  ;;  %v481_v51 = vpop.f32.mrf.mxu0  ;;  %v501_v52 = vpop.f32.mrf.mxu1 }
  0xaa   : > { %v640_v53 = vld [vmem:[#allocation2 + $0x80] sm:$0xff]  ;;  %v558_v57 = vadd.f32 %v481_v51, %v254_v54  ;;  %v566_v59 = vadd.f32 %v501_v52, %v262_v55  ;;  %v258_v54 = vld [vmem:[#allocation2 + $0x30] sm:$0xff] }
  0xab   : > { %672 = vst.msk [vmem:[%s1130_s29 + $0x80] sm:$0xff] %vm219_vm3, %v640_v53  ;;  %v266_v55 = vld [vmem:[#allocation2 + $0x70] sm:$0xff] }
  0xac   : > { %606 = vst.msk [vmem:[#allocation2 + $0x88] sm:$0xff] %vm219_vm3, %v573_v49 }
  0xad   : > { %v648_v56 = vld [vmem:[#allocation2 + $0xc0] sm:$0xff]  ;;  %614 = vst.msk [vmem:[#allocation2 + $0xc8] sm:$0xff] %vm219_vm3, %v581_v50 }
  0xae   : > { %680 = vst.msk [vmem:[%s1130_s29 + $0xc0] sm:$0xff] %vm219_vm3, %v648_v56  ;;  %v625_v58 = vld [vmem:[#allocation2 + $0x8] sm:$0xff] }
  0xaf   : > { %657 = vst.msk [vmem:[%s1130_s29 + $0x8] sm:$0xff] %vm219_vm3, %v625_v58  ;;  %v633_v61 = vld [vmem:[#allocation2 + $0x48] sm:$0xff] }
  0xb0   : > { %665 = vst.msk [vmem:[%s1130_s29 + $0x48] sm:$0xff] %vm219_vm3, %v633_v61  ;;  %v521_v63 = vpop.f32.mrf.mxu2  ;;  %v541_v0 = vpop.f32.mrf.mxu3 }
  0xb1   : > { %591 = vst.msk [vmem:[#allocation2 + $0x10] sm:$0xff] %vm219_vm3, %v558_v57  ;;  %v574_v2 = vadd.f32 %v521_v63, %v270_v60  ;;  %v483_v3 = vpop.f32.mrf.mxu0  ;;  %v503_v5 = vpop.f32.mrf.mxu1  ;;  %v582_v6 = vadd.f32 %v541_v0, %v278_v62  ;;  %v274_v60 = vld [vmem:[#allocation2 + $0xb0] sm:$0xff] }
  0xb2   : > { %599 = vst.msk [vmem:[#allocation2 + $0x50] sm:$0xff] %vm219_vm3, %v566_v59  ;;  %v559_v8 = vadd.f32 %v483_v3, %v255_v1  ;;  %v567_v10 = vadd.f32 %v503_v5, %v263_v4  ;;  %v282_v62 = vld [vmem:[#allocation2 + $0xf0] sm:$0xff]  ;;  %v259_v1 = vld [vmem:[#allocation2 + $0x38] sm:$0xff] }
  0xb3   : > { %v641_v7 = vld [vmem:[#allocation2 + $0x88] sm:$0xff]  ;;  %607 = vst.msk [vmem:[#allocation2 + $0x90] sm:$0xff] %vm219_vm3, %v574_v2  ;;  %v267_v4 = vld [vmem:[#allocation2 + $0x78] sm:$0xff] }
  0xb4   : > { %673 = vst.msk [vmem:[%s1130_s29 + $0x88] sm:$0xff] %vm219_vm3, %v641_v7  ;;  %v649_v9 = vld [vmem:[#allocation2 + $0xc8] sm:$0xff] }
  0xb5   : > { %681 = vst.msk [vmem:[%s1130_s29 + $0xc8] sm:$0xff] %vm219_vm3, %v649_v9 }
  0xb6   : > { %615 = vst.msk [vmem:[#allocation2 + $0xd0] sm:$0xff] %vm219_vm3, %v582_v6 }
  0xb7   : > { %592 = vst.msk [vmem:[#allocation2 + $0x18] sm:$0xff] %vm219_vm3, %v559_v8 }
  0xb8   : > { %v626_v13 = vld [vmem:[#allocation2 + $0x10] sm:$0xff]  ;;  %600 = vst.msk [vmem:[#allocation2 + $0x58] sm:$0xff] %vm219_vm3, %v567_v10  ;;  %v523_v14 = vpop.f32.mrf.mxu2  ;;  %v543_v15 = vpop.f32.mrf.mxu3 }
  0xb9   : > { %658 = vst.msk [vmem:[%s1130_s29 + $0x10] sm:$0xff] %vm219_vm3, %v626_v13  ;;  %v634_v16 = vld [vmem:[#allocation2 + $0x50] sm:$0xff]  ;;  %v575_v17 = vadd.f32 %v523_v14, %v271_v11  ;;  %v583_v18 = vadd.f32 %v543_v15, %v279_v12  ;;  %v486_v19 = vpop.f32.mrf.mxu0  ;;  %v506_v20 = vpop.f32.mrf.mxu1  ;;  %v275_v11 = vld [vmem:[#allocation2 + $0xb8] sm:$0xff] }
  0xba   : > { %666 = vst.msk [vmem:[%s1130_s29 + $0x50] sm:$0xff] %vm219_vm3, %v634_v16  ;;  %v642_v21 = vld [vmem:[#allocation2 + $0x90] sm:$0xff]  ;;  %v560_v25 = vadd.f32 %v486_v19, %v256_v22  ;;  %v568_v27 = vadd.f32 %v506_v20, %v264_v23  ;;  %v283_v12 = vld [vmem:[#allocation2 + $0xf8] sm:$0xff] }
  0xbb   : > { %674 = vst.msk [vmem:[%s1130_s29 + $0x90] sm:$0xff] %vm219_vm3, %v642_v21 }
  0xbc   : > { %608 = vst.msk [vmem:[#allocation2 + $0x98] sm:$0xff] %vm219_vm3, %v575_v17 }
  0xbd   : > { %v650_v24 = vld [vmem:[#allocation2 + $0xd0] sm:$0xff]  ;;  %616 = vst.msk [vmem:[#allocation2 + $0xd8] sm:$0xff] %vm219_vm3, %v583_v18 }
  0xbe   : > { %682 = vst.msk [vmem:[%s1130_s29 + $0xd0] sm:$0xff] %vm219_vm3, %v650_v24  ;;  %v627_v26 = vld [vmem:[#allocation2 + $0x18] sm:$0xff] }
  0xbf   : > { %659 = vst.msk [vmem:[%s1130_s29 + $0x18] sm:$0xff] %vm219_vm3, %v627_v26  ;;  %v635_v29 = vld [vmem:[#allocation2 + $0x58] sm:$0xff] }
  0xc0   : > { %667 = vst.msk [vmem:[%s1130_s29 + $0x58] sm:$0xff] %vm219_vm3, %v635_v29  ;;  %v526_v31 = vpop.f32.mrf.mxu2  ;;  %v546_v32 = vpop.f32.mrf.mxu3 }
  0xc1   : > { %593 = vst.msk [vmem:[#allocation2 + $0x20] sm:$0xff] %vm219_vm3, %v560_v25  ;;  %v576_v34 = vadd.f32 %v526_v31, %v272_v28  ;;  %v488_v35 = vpop.f32.mrf.mxu0  ;;  %v508_v37 = vpop.f32.mrf.mxu1  ;;  %v584_v38 = vadd.f32 %v546_v32, %v280_v30 }
  0xc2   : > { %601 = vst.msk [vmem:[#allocation2 + $0x60] sm:$0xff] %vm219_vm3, %v568_v27  ;;  %v561_v40 = vadd.f32 %v488_v35, %v257_v33  ;;  %v569_v42 = vadd.f32 %v508_v37, %v265_v36 }
  0xc3   : > { %v643_v39 = vld [vmem:[#allocation2 + $0x98] sm:$0xff]  ;;  %609 = vst.msk [vmem:[#allocation2 + $0xa0] sm:$0xff] %vm219_vm3, %v576_v34 }
  0xc4   : > { %675 = vst.msk [vmem:[%s1130_s29 + $0x98] sm:$0xff] %vm219_vm3, %v643_v39  ;;  %v651_v41 = vld [vmem:[#allocation2 + $0xd8] sm:$0xff] }
  0xc5   : > { %683 = vst.msk [vmem:[%s1130_s29 + $0xd8] sm:$0xff] %vm219_vm3, %v651_v41 }
  0xc6   : > { %617 = vst.msk [vmem:[#allocation2 + $0xe0] sm:$0xff] %vm219_vm3, %v584_v38 }
  0xc7   : > { %594 = vst.msk [vmem:[#allocation2 + $0x28] sm:$0xff] %vm219_vm3, %v561_v40 }
  0xc8   : > { %v628_v45 = vld [vmem:[#allocation2 + $0x20] sm:$0xff]  ;;  %602 = vst.msk [vmem:[#allocation2 + $0x68] sm:$0xff] %vm219_vm3, %v569_v42  ;;  %v528_v46 = vpop.f32.mrf.mxu2  ;;  %v548_v47 = vpop.f32.mrf.mxu3 }
  0xc9   : > { %660 = vst.msk [vmem:[%s1130_s29 + $0x20] sm:$0xff] %vm219_vm3, %v628_v45  ;;  %v636_v48 = vld [vmem:[#allocation2 + $0x60] sm:$0xff]  ;;  %v577_v49 = vadd.f32 %v528_v46, %v273_v43  ;;  %v585_v50 = vadd.f32 %v548_v47, %v281_v44  ;;  %v491_v51 = vpop.f32.mrf.mxu0  ;;  %v511_v52 = vpop.f32.mrf.mxu1 }
  0xca   : > { %668 = vst.msk [vmem:[%s1130_s29 + $0x60] sm:$0xff] %vm219_vm3, %v636_v48  ;;  %v644_v53 = vld [vmem:[#allocation2 + $0xa0] sm:$0xff]  ;;  %v562_v57 = vadd.f32 %v491_v51, %v258_v54  ;;  %v570_v59 = vadd.f32 %v511_v52, %v266_v55 }
  0xcb   : > { %676 = vst.msk [vmem:[%s1130_s29 + $0xa0] sm:$0xff] %vm219_vm3, %v644_v53 }
  0xcc   : > { %610 = vst.msk [vmem:[#allocation2 + $0xa8] sm:$0xff] %vm219_vm3, %v577_v49 }
  0xcd   : > { %v652_v56 = vld [vmem:[#allocation2 + $0xe0] sm:$0xff]  ;;  %618 = vst.msk [vmem:[#allocation2 + $0xe8] sm:$0xff] %vm219_vm3, %v585_v50 }
  0xce   : > { %684 = vst.msk [vmem:[%s1130_s29 + $0xe0] sm:$0xff] %vm219_vm3, %v652_v56  ;;  %v629_v58 = vld [vmem:[#allocation2 + $0x28] sm:$0xff] }
  0xcf   : > { %661 = vst.msk [vmem:[%s1130_s29 + $0x28] sm:$0xff] %vm219_vm3, %v629_v58  ;;  %v637_v61 = vld [vmem:[#allocation2 + $0x68] sm:$0xff] }
  0xd0   : > { %669 = vst.msk [vmem:[%s1130_s29 + $0x68] sm:$0xff] %vm219_vm3, %v637_v61  ;;  %v531_v63 = vpop.f32.mrf.mxu2  ;;  %v551_v0 = vpop.f32.mrf.mxu3 }
  0xd1   : > { %595 = vst.msk [vmem:[#allocation2 + $0x30] sm:$0xff] %vm219_vm3, %v562_v57  ;;  %v578_v2 = vadd.f32 %v531_v63, %v274_v60  ;;  %v493_v3 = vpop.f32.mrf.mxu0  ;;  %v513_v5 = vpop.f32.mrf.mxu1  ;;  %v586_v6 = vadd.f32 %v551_v0, %v282_v62 }
  0xd2   : > { %603 = vst.msk [vmem:[#allocation2 + $0x70] sm:$0xff] %vm219_vm3, %v570_v59  ;;  %v563_v8 = vadd.f32 %v493_v3, %v259_v1  ;;  %v571_v10 = vadd.f32 %v513_v5, %v267_v4 }
  0xd3   : > { %v645_v7 = vld [vmem:[#allocation2 + $0xa8] sm:$0xff]  ;;  %611 = vst.msk [vmem:[#allocation2 + $0xb0] sm:$0xff] %vm219_vm3, %v578_v2 }
  0xd4   : > { %677 = vst.msk [vmem:[%s1130_s29 + $0xa8] sm:$0xff] %vm219_vm3, %v645_v7  ;;  %v653_v9 = vld [vmem:[#allocation2 + $0xe8] sm:$0xff] }
  0xd5   : > { %685 = vst.msk [vmem:[%s1130_s29 + $0xe8] sm:$0xff] %vm219_vm3, %v653_v9 }
  0xd6   : > { %619 = vst.msk [vmem:[#allocation2 + $0xf0] sm:$0xff] %vm219_vm3, %v586_v6 }
  0xd7   : > { %596 = vst.msk [vmem:[#allocation2 + $0x38] sm:$0xff] %vm219_vm3, %v563_v8 }
  0xd8   : > { %v630_v13 = vld [vmem:[#allocation2 + $0x30] sm:$0xff]  ;;  %604 = vst.msk [vmem:[#allocation2 + $0x78] sm:$0xff] %vm219_vm3, %v571_v10  ;;  %v533_v14 = vpop.f32.mrf.mxu2  ;;  %v553_v15 = vpop.f32.mrf.mxu3 }
  0xd9   : > { %662 = vst.msk [vmem:[%s1130_s29 + $0x30] sm:$0xff] %vm219_vm3, %v630_v13  ;;  %v638_v16 = vld [vmem:[#allocation2 + $0x70] sm:$0xff]  ;;  %v579_v17 = vadd.f32 %v533_v14, %v275_v11  ;;  %v587_v18 = vadd.f32 %v553_v15, %v283_v12 }
  0xda   : > { %670 = vst.msk [vmem:[%s1130_s29 + $0x70] sm:$0xff] %vm219_vm3, %v638_v16  ;;  %v646_v19 = vld [vmem:[#allocation2 + $0xb0] sm:$0xff] }
  0xdb   : > { %678 = vst.msk [vmem:[%s1130_s29 + $0xb0] sm:$0xff] %vm219_vm3, %v646_v19 }
  0xdc   : > { %612 = vst.msk [vmem:[#allocation2 + $0xb8] sm:$0xff] %vm219_vm3, %v579_v17 }
  0xdd   : > { %v654_v20 = vld [vmem:[#allocation2 + $0xf0] sm:$0xff]  ;;  %620 = vst.msk [vmem:[#allocation2 + $0xf8] sm:$0xff] %vm219_vm3, %v587_v18 }
  0xde   : > { %686 = vst.msk [vmem:[%s1130_s29 + $0xf0] sm:$0xff] %vm219_vm3, %v654_v20  ;;  %v631_v21 = vld [vmem:[#allocation2 + $0x38] sm:$0xff] }
  0xdf   : > { %663 = vst.msk [vmem:[%s1130_s29 + $0x38] sm:$0xff] %vm219_vm3, %v631_v21  ;;  %v639_v22 = vld [vmem:[#allocation2 + $0x78] sm:$0xff] }
  0xe0   : > { %671 = vst.msk [vmem:[%s1130_s29 + $0x78] sm:$0xff] %vm219_vm3, %v639_v22 }
  0xe3   : > { %v647_v23 = vld [vmem:[#allocation2 + $0xb8] sm:$0xff] }
  0xe4   : > { %679 = vst.msk [vmem:[%s1130_s29 + $0xb8] sm:$0xff] %vm219_vm3, %v647_v23  ;;  %v655_v24 = vld [vmem:[#allocation2 + $0xf8] sm:$0xff] }
  0xe5   : > { %687 = vst.msk [vmem:[%s1130_s29 + $0xf8] sm:$0xff] %vm219_vm3, %v655_v24 }
  0xe6 PF: > { %s13_s11 = sadd.s32 1, %s1005_s11   ;;  %s1238_s9 = smov %s1001_s10 }
  0xe7   : > { %p10_p8 = scmp.ge.s32.totalorder %s13_s11, 18   ;;  %s1239_s10 = smov %s1241_s13 }
  0xe9   :  { %12 = sbr.rel (!%p10_p8) target bundleno = 2 (0x2), region = 72 }
  0xee   :  { %716 = vsyncpa [#allocation4], 1 }
  0xef   :  { %718 = vsyncpa [#allocation4 + $0x1], 1 }

</bundles_post_ra>
